<compile_context>
chip_gen: v7x
topology: tpu7x:2x2x1
jax: 0.10.0
libtpu: 0.0.40
codegen_flags: <defaults>
</compile_context>

<pallas_src>
import functools
import math

import jax
import jax.numpy as jnp
from jax.experimental import pallas as pl
from jax.experimental.pallas import tpu as pltpu


_LN_EPS = 1e-5
_NEG_INF = -1e30                      # finite mask value: avoids inf-inf -> NaN on padded rows
_INV_SQRT2 = 1.0 / math.sqrt(2.0)


def _layer_norm(x, gamma, beta):
    x = x.astype(jnp.float32)
    mu = jnp.mean(x, axis=-1, keepdims=True)
    var = jnp.mean((x - mu) ** 2, axis=-1, keepdims=True)
    return (x - mu) * jax.lax.rsqrt(var + _LN_EPS) * gamma + beta


def _vmem_limit(n_bytes):
    """Generation-aware VMEM budget: footprint + headroom, capped at ~90% of physical."""
    try:
        phys = int(pltpu.get_tpu_info().vmem_capacity_bytes)
    except Exception:                                   # pragma: no cover
        phys = 64 * 1024 * 1024                         # conservative (v7x) fallback
    cap = (phys * 9) // 10
    return int(min(cap, max(32 * 1024 * 1024, n_bytes + (8 << 20))))


def _const_spec(shape, index_map):
    """BlockSpec for a constant-index (weight/bias) operand: single-buffered.

    Double-buffering a constant block wastes VMEM with zero overlap benefit.
    Falls back to a plain BlockSpec if pipeline_mode/Buffered is unavailable.
    """
    try:
        return pl.BlockSpec(shape, index_map, pipeline_mode=pl.Buffered(1))
    except Exception:                                   # pragma: no cover
        return pl.BlockSpec(shape, index_map)


# ---------------- pass 1: LayerNorm1 + QKV projection (head-major outputs) ----------------
def _ln_qkv_kernel(x_ref, ln1_g_ref, ln1_b_ref, qkv_w_ref, qkv_b_ref,
                   q_ref, k_ref, v_ref, *, n_heads, head_dim, q_scale):
    tile = x_ref.shape[1]
    D = x_ref.shape[2]
    xn = _layer_norm(x_ref[0], ln1_g_ref[...], ln1_b_ref[...])                 # f32 stats
    qkv = jnp.dot(xn.astype(qkv_w_ref.dtype), qkv_w_ref[...],
                  preferred_element_type=jnp.float32) + qkv_b_ref[...]         # (tile, 3D) f32

    # Wrapper permuted qkv weight columns to [Q | K | V] (head-major), so these are
    # D-wide lane-aligned slices.  One relayout per tensor per tile here removes ALL
    # per-KV-step relayouts in pass 2.  1/sqrt(hd) folded into Q once.
    def head_major(blk):
        return jnp.transpose(blk.reshape(tile, n_heads, head_dim), (1, 0, 2))  # (H, tile, hd)

    q_ref[0] = (head_major(qkv[:, :D]) * q_scale).astype(q_ref.dtype)
    k_ref[0] = head_major(qkv[:, D:2 * D]).astype(k_ref.dtype)
    v_ref[0] = head_major(qkv[:, 2 * D:]).astype(v_ref.dtype)


# -------- pass 2: flash attention (triangular grid) + out proj + LN2 + chunked FFN --------
def _attn_ffn_kernel(qi_tbl, ki_tbl,                       # scalar-prefetch (SMEM)
                     x_ref, q_ref, k_ref, v_ref,
                     out_w_ref, out_b_ref, ln2_g_ref, ln2_b_ref,
                     w1_ref, b1_ref, w2_ref, b2_ref,
                     o_ref, m_ref, l_ref, acc_ref):
    step = pl.program_id(1)
    qi = qi_tbl[step]
    ki = ki_tbl[step]
    n_heads, tq, hd = q_ref.shape[1], q_ref.shape[2], q_ref.shape[3]
    tk = k_ref.shape[2]
    D = n_heads * hd
    cdt = q_ref.dtype

    @pl.when(ki == 0)
    def _init():
        m_ref[...] = jnp.full_like(m_ref, _NEG_INF)
        l_ref[...] = jnp.zeros_like(l_ref)
        acc_ref[...] = jnp.zeros_like(acc_ref)

    # Q/K/V arrive head-major (H, tile, hd): no reshuffle, straight into the MXU.
    qh = q_ref[0]
    kh = k_ref[0]
    vh = v_ref[0]
    s = jnp.einsum("hqd,hkd->hqk", qh, kh,
                   preferred_element_type=jnp.float32)                         # (H, tq, tk) f32

    def _online_update(scores):
        m_prev = m_ref[...]
        m_new = jnp.maximum(m_prev, jnp.max(scores, axis=-1, keepdims=True))
        alpha = jnp.exp(m_prev - m_new)
        p = jnp.exp(scores - m_new)
        l_ref[...] = alpha * l_ref[...] + jnp.sum(p, axis=-1, keepdims=True)
        acc_ref[...] = alpha * acc_ref[...] + jnp.einsum(
            "hqk,hkd->hqd", p.astype(cdt), vh, preferred_element_type=jnp.float32)
        m_ref[...] = m_new

    # Strictly-below-diagonal tiles are fully causal-valid: no mask work at all.
    @pl.when(ki != qi)
    def _interior():
        _online_update(s)

    # Diagonal tile (always the LAST KV step for this q tile in the triangular grid):
    # apply the causal mask, then finalize.  Padded key columns only ever appear here
    # (last q row's diagonal tile) and are killed by this same mask.
    @pl.when(ki == qi)
    def _diag_and_finalize():
        rows = jax.lax.broadcasted_iota(jnp.int32, (tq, tk), 0)
        cols = jax.lax.broadcasted_iota(jnp.int32, (tq, tk), 1)
        _online_update(jnp.where((rows >= cols)[None], s, _NEG_INF))

        # Normalize the (H, tq, hd) accumulator once (EUP reciprocal) instead of
        # dividing the probabilities every KV step.
        inv_l = pl.reciprocal(l_ref[...], approx=True)
        attn = jnp.transpose(acc_ref[...] * inv_l, (1, 0, 2)).reshape(tq, D)

        x0 = x_ref[0]                                                           # residual
        x1 = x0 + jnp.dot(attn.astype(out_w_ref.dtype), out_w_ref[...],
                          preferred_element_type=jnp.float32) + out_b_ref[...]

        x2n = _layer_norm(x1, ln2_g_ref[...], ln2_b_ref[...]).astype(w1_ref.dtype)

        # FFN hidden dim chunked via fori_loop; weights are pre-reshaped so the loop
        # only does leading-dim dynamic indexing (no dynamic lane slices), and the
        # (tq, chunk) temporaries have clean per-chunk live ranges.
        n_chunks = w1_ref.shape[0]

        def _ffn_chunk(c, acc):
            h = jnp.dot(x2n, w1_ref[c], preferred_element_type=jnp.float32) + b1_ref[c]
            g = 0.5 * h * (1.0 + jax.lax.erf(h * _INV_SQRT2))                   # exact GELU
            return acc + jnp.dot(g.astype(w2_ref.dtype), w2_ref[c],
                                 preferred_element_type=jnp.float32)

        ffn = jax.lax.fori_loop(0, n_chunks, _ffn_chunk,
                                jnp.zeros((tq, D), jnp.float32),
                                unroll=n_chunks <= 8)
        o_ref[0] = (x1 + ffn + b2_ref[...]).astype(o_ref.dtype)


def flash_decoder_block(x, params, n_heads, *, compute_dtype=jnp.bfloat16,
                        seq_tile=256, hidden_chunk=512):
    """Pallas TPU forward of FlashDecoderBlock (eval mode, lens=None)."""
    # TODO(synk): dropout is treated as identity (eval mode); lens-based masking not supported.
    B, T, D = x.shape
    assert D % n_heads == 0
    hd = D // n_heads
    hidden = params["w1"].shape[1]
    cdt = jnp.dtype(compute_dtype)

    # ---- sequence tiling (pad T to a multiple of the tile when tiled) ----
    if T <= seq_tile:
        tile, T_pad = T, T
    else:
        tile = seq_tile                                   # multiple of 8 (sublane constraint)
        T_pad = ((T + tile - 1) // tile) * tile
    x_p = x if T_pad == T else jnp.pad(x, ((0, 0), (0, T_pad - T), (0, 0)))
    n_q = T_pad // tile

    # ---- FFN hidden chunking (largest divisor of hidden <= requested chunk) ----
    chunk = min(hidden_chunk, hidden)
    while chunk > 1 and hidden % chunk != 0:
        chunk -= 1
    if chunk <= 0 or hidden % chunk != 0:
        chunk = hidden
    n_chunks = hidden // chunk

    # ---- weight prep (one-time, wrapper side) ----
    # PyTorch interleaves (q,k,v) per head along the qkv output columns; permute to
    # [Q | K | V] head-major so in-kernel slices fall on D-aligned boundaries.
    perm = jnp.transpose(jnp.arange(3 * D).reshape(n_heads, 3, hd), (1, 0, 2)).reshape(-1)
    qkv_w = params["qkv_w"][:, perm].astype(cdt)
    qkv_b = params["qkv_b"][:, perm]                      # bias added in f32
    out_w = params["out_w"].astype(cdt)
    # FFN weights reshaped to chunk-major slabs for leading-dim indexing in-kernel.
    w1c = params["w1"].reshape(D, n_chunks, chunk).transpose(1, 0, 2).astype(cdt)
    b1c = params["b1"].reshape(n_chunks, 1, chunk)
    w2c = params["w2"].reshape(n_chunks, chunk, D).astype(cdt)
    out_b, b2 = params["out_b"], params["b2"]
    ln1_g, ln1_b = params["ln1_g"], params["ln1_b"]
    ln2_g, ln2_b = params["ln2_g"], params["ln2_b"]

    f32 = 4
    cds = cdt.itemsize

    # ---------------- pass 1: LN1 + QKV projection ----------------
    # Weights single-buffered (constant index); activations double-buffered.
    wt1 = 3 * D * D * cds + 5 * D * f32
    act1 = tile * D * (f32 + 3 * cds)
    vmem1 = _vmem_limit(wt1 + 2 * act1 + 4 * tile * D * f32)
    q, k, v = pl.pallas_call(
        functools.partial(_ln_qkv_kernel, n_heads=n_heads, head_dim=hd,
                          q_scale=1.0 / math.sqrt(hd)),
        out_shape=[jax.ShapeDtypeStruct((B, n_heads, T_pad, hd), cdt)] * 3,
        grid=(B, n_q),
        in_specs=[
            pl.BlockSpec((1, tile, D), lambda b, i: (b, i, 0)),          # x
            _const_spec((1, D), lambda b, i: (0, 0)),                    # ln1 gamma
            _const_spec((1, D), lambda b, i: (0, 0)),                    # ln1 beta
            _const_spec((D, 3 * D), lambda b, i: (0, 0)),                # qkv weight (permuted)
            _const_spec((1, 3 * D), lambda b, i: (0, 0)),                # qkv bias (permuted)
        ],
        out_specs=[pl.BlockSpec((1, n_heads, tile, hd), lambda b, i: (b, 0, i, 0))] * 3,
        compiler_params=pltpu.CompilerParams(
            dimension_semantics=("parallel", "parallel"),
            vmem_limit_bytes=vmem1),
    )(x_p, ln1_g, ln1_b, qkv_w, qkv_b)

    # -------- pass 2: flash attention over a lower-triangular flattened grid --------
    # Only (qi, ki<=qi) tiles exist in the grid, so upper-triangle K/V blocks are never
    # DMA'd and no grid steps are wasted.  Steps for a given qi are consecutive with the
    # diagonal (ki == qi) last, which doubles as the finalize step.
    pairs = [(a, c) for a in range(n_q) for c in range(a + 1)]
    qi_tbl = jnp.asarray([p[0] for p in pairs], jnp.int32)
    ki_tbl = jnp.asarray([p[1] for p in pairs], jnp.int32)
    n_steps = len(pairs)

    wt2 = (D * D + 2 * D * hidden) * cds + (hidden + 5 * D) * f32       # single-buffered
    act2 = tile * D * (2 * f32 + 3 * cds)                               # per-buffer activations
    scr2 = n_heads * tile * (hd + 2) * f32
    tmp2 = 2 * n_heads * tile * tile * f32 + 2 * tile * chunk * f32 + 3 * tile * D * f32
    vmem2 = _vmem_limit(wt2 + 2 * act2 + scr2 + tmp2)

    # TODO(synk): for v7x-scale D/hidden, stream w1c/w2c chunks from HBM (memory_space=pl.ANY
    # + emit_pipeline) instead of holding them resident; and for B == 1 add a parallel split
    # of q tiles so both TensorCores get work.
    grid_spec = pltpu.PrefetchScalarGridSpec(
        num_scalar_prefetch=2,
        grid=(B, n_steps),
        in_specs=[
            pl.BlockSpec((1, tile, D), lambda b, s, qt, kt: (b, qt[s], 0)),            # residual
            pl.BlockSpec((1, n_heads, tile, hd), lambda b, s, qt, kt: (b, 0, qt[s], 0)),  # q
            pl.BlockSpec((1, n_heads, tile, hd), lambda b, s, qt, kt: (b, 0, kt[s], 0)),  # k
            pl.BlockSpec((1, n_heads, tile, hd), lambda b, s, qt, kt: (b, 0, kt[s], 0)),  # v
            _const_spec((D, D), lambda b, s, qt, kt: (0, 0)),                           # out_w
            _const_spec((1, D), lambda b, s, qt, kt: (0, 0)),                           # out_b
            _const_spec((1, D), lambda b, s, qt, kt: (0, 0)),                           # ln2 g
            _const_spec((1, D), lambda b, s, qt, kt: (0, 0)),                           # ln2 b
            _const_spec((n_chunks, D, chunk), lambda b, s, qt, kt: (0, 0, 0)),          # w1
            _const_spec((n_chunks, 1, chunk), lambda b, s, qt, kt: (0, 0, 0)),          # b1
            _const_spec((n_chunks, chunk, D), lambda b, s, qt, kt: (0, 0, 0)),          # w2
            _const_spec((1, D), lambda b, s, qt, kt: (0, 0)),                           # b2
        ],
        out_specs=pl.BlockSpec((1, tile, D), lambda b, s, qt, kt: (b, qt[s], 0)),
        scratch_shapes=[
            pltpu.VMEM((n_heads, tile, 1), jnp.float32),    # running max
            pltpu.VMEM((n_heads, tile, 1), jnp.float32),    # running denominator
            pltpu.VMEM((n_heads, tile, hd), jnp.float32),   # output accumulator
        ],
    )
    out = pl.pallas_call(
        _attn_ffn_kernel,
        out_shape=jax.ShapeDtypeStruct((B, T_pad, D), x.dtype),
        grid_spec=grid_spec,
        compiler_params=pltpu.CompilerParams(
            dimension_semantics=("parallel", "arbitrary"),
            vmem_limit_bytes=vmem2),
    )(qi_tbl, ki_tbl, x_p, q, k, v, out_w, out_b, ln2_g, ln2_b, w1c, b1c, w2c, b2)

    return out if T_pad == T else out[:, :T, :]


def reference_block(x, p, n_heads):
    """Pure-JAX reference mirroring the PyTorch forward (eval mode)."""
    B, T, D = x.shape
    hd = D // n_heads

    def ln(z, g, b):
        mu = z.mean(-1, keepdims=True)
        var = ((z - mu) ** 2).mean(-1, keepdims=True)
        return (z - mu) / jnp.sqrt(var + 1e-5) * g + b

    xn = ln(x, p["ln1_g"][0], p["ln1_b"][0])
    qkv = xn @ p["qkv_w"] + p["qkv_b"][0]
    qkv = qkv.reshape(B, T, n_heads, 3 * hd).transpose(0, 2, 1, 3)
    q, k, v = jnp.split(qkv, 3, axis=-1)
    s = jnp.einsum("bhtd,bhsd->bhts", q, k) / math.sqrt(hd)
    mask = jnp.tril(jnp.ones((T, T), dtype=bool))
    s = jnp.where(mask, s, -jnp.inf)
    pa = jax.nn.softmax(s, axis=-1)
    out = jnp.einsum("bhts,bhsd->bhtd", pa, v).transpose(0, 2, 1, 3).reshape(B, T, D)
    x1 = x + out @ p["out_w"] + p["out_b"][0]
    x2n = ln(x1, p["ln2_g"][0], p["ln2_b"][0])
    h = x2n @ p["w1"] + p["b1"][0]
    h = 0.5 * h * (1.0 + jax.lax.erf(h / math.sqrt(2.0)))
    return x1 + h @ p["w2"] + p["b2"][0]


if __name__ == "__main__":
    B, T, D, H = 2, 8, 32, 4
    mlp_ratio = 4.0
    hidden = int(D * mlp_ratio)

    key = jax.random.PRNGKey(0)
    keys = jax.random.split(key, 12)
    params = {
        "qkv_w": 0.05 * jax.random.normal(keys[0], (D, 3 * D), jnp.float32),
        "qkv_b": 0.05 * jax.random.normal(keys[1], (1, 3 * D), jnp.float32),
        "out_w": 0.05 * jax.random.normal(keys[2], (D, D), jnp.float32),
        "out_b": 0.05 * jax.random.normal(keys[3], (1, D), jnp.float32),
        "ln1_g": jnp.ones((1, D), jnp.float32) + 0.05 * jax.random.normal(keys[4], (1, D)),
        "ln1_b": 0.05 * jax.random.normal(keys[5], (1, D), jnp.float32),
        "w1": 0.05 * jax.random.normal(keys[6], (D, hidden), jnp.float32),
        "b1": 0.05 * jax.random.normal(keys[7], (1, hidden), jnp.float32),
        "w2": 0.05 * jax.random.normal(keys[8], (hidden, D), jnp.float32),
        "b2": 0.05 * jax.random.normal(keys[9], (1, D), jnp.float32),
        "ln2_g": jnp.ones((1, D), jnp.float32) + 0.05 * jax.random.normal(keys[10], (1, D)),
        "ln2_b": 0.05 * jax.random.normal(keys[11], (1, D), jnp.float32),
    }
    x = jax.random.normal(jax.random.PRNGKey(42), (B, T, D), jnp.float32)
    ref = reference_block(x, params, n_heads=H)

    # f32 compute path (tight check; approx reciprocal only source of extra error)
    out_f32 = jax.block_until_ready(
        flash_decoder_block(x, params, n_heads=H, compute_dtype=jnp.float32))
    assert jnp.allclose(out_f32, ref, atol=5e-3, rtol=5e-3), "f32 path mismatch vs reference"

    # bf16 matmul path (production default)
    out_bf16 = jax.block_until_ready(
        flash_decoder_block(x, params, n_heads=H, compute_dtype=jnp.bfloat16))
    assert jnp.allclose(out_bf16, ref, atol=5e-2, rtol=5e-2), "bf16 path mismatch vs reference"

    # Multi-tile path: T not a multiple of the tile -> exercises padding, the flattened
    # lower-triangular grid (3 steps for 2 q tiles), diagonal-only masking, online softmax
    # across KV tiles, and the chunked-FFN fori_loop (hidden=128, chunk=64 -> 2 chunks).
    T2 = 12
    x2 = jax.random.normal(jax.random.PRNGKey(7), (B, T2, D), jnp.float32)
    ref2 = reference_block(x2, params, n_heads=H)
    out2 = jax.block_until_ready(
        flash_decoder_block(x2, params, n_heads=H, compute_dtype=jnp.float32,
                            seq_tile=8, hidden_chunk=64))
    assert jnp.allclose(out2, ref2, atol=5e-3, rtol=5e-3), "tiled path mismatch vs reference"

    print("KERNEL_OK")
</pallas_src>

<mosaic_0001>
module attributes {stable_mosaic.version = 11 : i64} {
  func.func @_ln_qkv_kernel(%arg0: i32, %arg1: i32, %arg2: memref<1x8x32xf32, #tpu.memory_space<vmem>>, %arg3: memref<1x32xf32, #tpu.memory_space<vmem>>, %arg4: memref<1x32xf32, #tpu.memory_space<vmem>>, %arg5: memref<32x96xf32, #tpu.memory_space<vmem>>, %arg6: memref<1x96xf32, #tpu.memory_space<vmem>>, %arg7: memref<1x4x8x8xf32, #tpu.memory_space<vmem>>, %arg8: memref<1x4x8x8xf32, #tpu.memory_space<vmem>>, %arg9: memref<1x4x8x8xf32, #tpu.memory_space<vmem>>) attributes {dimension_semantics = [#tpu.dimension_semantics<parallel>, #tpu.dimension_semantics<parallel>], iteration_bounds = array<i64: 2, 1>, scalar_prefetch = 0 : i64, scratch_operands = 0 : i64, tpu.core_type = #tpu.core_type<tc>, window_params = [{transform_indices = @transform_0, window_bounds = array<i64: 1, 8, 32>}, {pipeline_mode = #tpu.pipeline_mode<synchronous>, transform_indices = @transform_1, window_bounds = array<i64: 1, 32>}, {pipeline_mode = #tpu.pipeline_mode<synchronous>, transform_indices = @transform_2, window_bounds = array<i64: 1, 32>}, {pipeline_mode = #tpu.pipeline_mode<synchronous>, transform_indices = @transform_3, window_bounds = array<i64: 32, 96>}, {pipeline_mode = #tpu.pipeline_mode<synchronous>, transform_indices = @transform_4, window_bounds = array<i64: 1, 96>}, {transform_indices = @transform_5, window_bounds = array<i64: 1, 4, 8, 8>}, {transform_indices = @transform_6, window_bounds = array<i64: 1, 4, 8, 8>}, {transform_indices = @transform_7, window_bounds = array<i64: 1, 4, 8, 8>}]} {
    %c0 = arith.constant 0 : index
    %c0_0 = arith.constant 0 : index
    %c0_1 = arith.constant 0 : index
    %0 = vector.load %arg2[%c0, %c0_0, %c0_1] : memref<1x8x32xf32, #tpu.memory_space<vmem>>, vector<1x8x32xf32>
    %1 = vector.shape_cast %0 : vector<1x8x32xf32> to vector<8x32xf32>
    %c0_2 = arith.constant 0 : index
    %c0_3 = arith.constant 0 : index
    %2 = vector.load %arg3[%c0_2, %c0_3] : memref<1x32xf32, #tpu.memory_space<vmem>>, vector<1x32xf32>
    %c0_4 = arith.constant 0 : index
    %c0_5 = arith.constant 0 : index
    %3 = vector.load %arg4[%c0_4, %c0_5] : memref<1x32xf32, #tpu.memory_space<vmem>>, vector<1x32xf32>
    %cst = arith.constant dense<0.000000e+00> : vector<8xf32>
    %4 = vector.multi_reduction <add>, %1, %cst [1] : vector<8x32xf32> to vector<8xf32>
    %5 = vector.shape_cast %4 : vector<8xf32> to vector<8x1xf32>
    %cst_6 = arith.constant 3.200000e+01 : f32
    %6 = vector.broadcast %cst_6 : f32 to vector<8x1xf32>
    %7 = arith.divf %5, %6 : vector<8x1xf32>
    %8 = vector.broadcast %7 : vector<8x1xf32> to vector<8x32xf32>
    %9 = arith.subf %1, %8 : vector<8x32xf32>
    %10 = arith.mulf %9, %9 : vector<8x32xf32>
    %cst_7 = arith.constant dense<0.000000e+00> : vector<8xf32>
    %11 = vector.multi_reduction <add>, %10, %cst_7 [1] : vector<8x32xf32> to vector<8xf32>
    %12 = vector.shape_cast %11 : vector<8xf32> to vector<8x1xf32>
    %cst_8 = arith.constant 3.200000e+01 : f32
    %13 = vector.broadcast %cst_8 : f32 to vector<8x1xf32>
    %14 = arith.divf %12, %13 : vector<8x1xf32>
    %15 = vector.broadcast %7 : vector<8x1xf32> to vector<8x32xf32>
    %16 = arith.subf %1, %15 : vector<8x32xf32>
    %cst_9 = arith.constant 9.99999974E-6 : f32
    %17 = vector.broadcast %cst_9 : f32 to vector<8x1xf32>
    %18 = arith.addf %14, %17 : vector<8x1xf32>
    %19 = math.rsqrt %18 : vector<8x1xf32>
    %20 = vector.broadcast %19 : vector<8x1xf32> to vector<8x32xf32>
    %21 = arith.mulf %16, %20 : vector<8x32xf32>
    %22 = vector.broadcast %2 : vector<1x32xf32> to vector<8x32xf32>
    %23 = arith.mulf %21, %22 : vector<8x32xf32>
    %24 = vector.broadcast %3 : vector<1x32xf32> to vector<8x32xf32>
    %25 = arith.addf %23, %24 : vector<8x32xf32>
    %c0_10 = arith.constant 0 : index
    %c0_11 = arith.constant 0 : index
    %26 = vector.load %arg5[%c0_10, %c0_11] : memref<32x96xf32, #tpu.memory_space<vmem>>, vector<32x96xf32>
    %cst_12 = arith.constant dense<0.000000e+00> : vector<8x96xf32>
    %27 = tpu.matmul %25, %26, %cst_12 {dimension_numbers = #tpu.dot_dimension_numbers<[1], [0], [0], [1], [0, 0, 1, 1], [], []>} : vector<8x32xf32>, vector<32x96xf32>, vector<8x96xf32> -> vector<8x96xf32>
    %c0_13 = arith.constant 0 : index
    %c0_14 = arith.constant 0 : index
    %28 = vector.load %arg6[%c0_13, %c0_14] : memref<1x96xf32, #tpu.memory_space<vmem>>, vector<1x96xf32>
    %29 = vector.broadcast %28 : vector<1x96xf32> to vector<8x96xf32>
    %30 = arith.addf %27, %29 : vector<8x96xf32>
    %31 = vector.extract_strided_slice %30 {offsets = [0, 0], sizes = [8, 32], strides = [1, 1]} : vector<8x96xf32> to vector<8x32xf32>
    %32 = vector.shape_cast %31 : vector<8x32xf32> to vector<8x4x8xf32>
    %33 = tpu.transpose %32, [1, 0, 2] : vector<8x4x8xf32> -> vector<4x8x8xf32>
    %cst_15 = arith.constant 0.353553385 : f32
    %34 = vector.broadcast %cst_15 : f32 to vector<4x8x8xf32>
    %35 = arith.mulf %33, %34 : vector<4x8x8xf32>
    %c0_16 = arith.constant 0 : index
    %c0_17 = arith.constant 0 : index
    %c0_18 = arith.constant 0 : index
    %c0_19 = arith.constant 0 : index
    %36 = vector.load %arg7[%c0_16, %c0_17, %c0_18, %c0_19] : memref<1x4x8x8xf32, #tpu.memory_space<vmem>>, vector<1x4x8x8xf32>
    %37 = vector.shape_cast %36 : vector<1x4x8x8xf32> to vector<4x8x8xf32>
    %38 = vector.shape_cast %35 : vector<4x8x8xf32> to vector<1x4x8x8xf32>
    tpu.vector_store %arg7[%c0_16, %c0_17, %c0_18, %c0_19], %38 {strides = array<i32>} : memref<1x4x8x8xf32, #tpu.memory_space<vmem>>, vector<1x4x8x8xf32>,
    %39 = vector.extract_strided_slice %30 {offsets = [0, 32], sizes = [8, 32], strides = [1, 1]} : vector<8x96xf32> to vector<8x32xf32>
    %40 = vector.shape_cast %39 : vector<8x32xf32> to vector<8x4x8xf32>
    %41 = tpu.transpose %40, [1, 0, 2] : vector<8x4x8xf32> -> vector<4x8x8xf32>
    %c0_20 = arith.constant 0 : index
    %c0_21 = arith.constant 0 : index
    %c0_22 = arith.constant 0 : index
    %c0_23 = arith.constant 0 : index
    %42 = vector.load %arg8[%c0_20, %c0_21, %c0_22, %c0_23] : memref<1x4x8x8xf32, #tpu.memory_space<vmem>>, vector<1x4x8x8xf32>
    %43 = vector.shape_cast %42 : vector<1x4x8x8xf32> to vector<4x8x8xf32>
    %44 = vector.shape_cast %41 : vector<4x8x8xf32> to vector<1x4x8x8xf32>
    tpu.vector_store %arg8[%c0_20, %c0_21, %c0_22, %c0_23], %44 {strides = array<i32>} : memref<1x4x8x8xf32, #tpu.memory_space<vmem>>, vector<1x4x8x8xf32>,
    %45 = vector.extract_strided_slice %30 {offsets = [0, 64], sizes = [8, 32], strides = [1, 1]} : vector<8x96xf32> to vector<8x32xf32>
    %46 = vector.shape_cast %45 : vector<8x32xf32> to vector<8x4x8xf32>
    %47 = tpu.transpose %46, [1, 0, 2] : vector<8x4x8xf32> -> vector<4x8x8xf32>
    %c0_24 = arith.constant 0 : index
    %c0_25 = arith.constant 0 : index
    %c0_26 = arith.constant 0 : index
    %c0_27 = arith.constant 0 : index
    %48 = vector.load %arg9[%c0_24, %c0_25, %c0_26, %c0_27] : memref<1x4x8x8xf32, #tpu.memory_space<vmem>>, vector<1x4x8x8xf32>
    %49 = vector.shape_cast %48 : vector<1x4x8x8xf32> to vector<4x8x8xf32>
    %50 = vector.shape_cast %47 : vector<4x8x8xf32> to vector<1x4x8x8xf32>
    tpu.vector_store %arg9[%c0_24, %c0_25, %c0_26, %c0_27], %50 {strides = array<i32>} : memref<1x4x8x8xf32, #tpu.memory_space<vmem>>, vector<1x4x8x8xf32>,
    return
  }
  func.func @transform_0(%arg0: i32, %arg1: i32) -> (i32, i32, i32) {
    %c0_i32 = arith.constant 0 : i32
    %c0_i32_0 = arith.constant 0 : i32
    return %arg0, %arg1, %c0_i32 : i32, i32, i32
  }
  func.func @transform_1(%arg0: i32, %arg1: i32) -> (i32, i32) {
    %c0_i32 = arith.constant 0 : i32
    %c0_i32_0 = arith.constant 0 : i32
    %c0_i32_1 = arith.constant 0 : i32
    return %c0_i32, %c0_i32_0 : i32, i32
  }
  func.func @transform_2(%arg0: i32, %arg1: i32) -> (i32, i32) {
    %c0_i32 = arith.constant 0 : i32
    %c0_i32_0 = arith.constant 0 : i32
    %c0_i32_1 = arith.constant 0 : i32
    return %c0_i32, %c0_i32_0 : i32, i32
  }
  func.func @transform_3(%arg0: i32, %arg1: i32) -> (i32, i32) {
    %c0_i32 = arith.constant 0 : i32
    %c0_i32_0 = arith.constant 0 : i32
    %c0_i32_1 = arith.constant 0 : i32
    return %c0_i32, %c0_i32_0 : i32, i32
  }
  func.func @transform_4(%arg0: i32, %arg1: i32) -> (i32, i32) {
    %c0_i32 = arith.constant 0 : i32
    %c0_i32_0 = arith.constant 0 : i32
    %c0_i32_1 = arith.constant 0 : i32
    return %c0_i32, %c0_i32_0 : i32, i32
  }
  func.func @transform_5(%arg0: i32, %arg1: i32) -> (i32, i32, i32, i32) {
    %c0_i32 = arith.constant 0 : i32
    %c0_i32_0 = arith.constant 0 : i32
    %c0_i32_1 = arith.constant 0 : i32
    return %arg0, %c0_i32, %arg1, %c0_i32_0 : i32, i32, i32, i32
  }
  func.func @transform_6(%arg0: i32, %arg1: i32) -> (i32, i32, i32, i32) {
    %c0_i32 = arith.constant 0 : i32
    %c0_i32_0 = arith.constant 0 : i32
    %c0_i32_1 = arith.constant 0 : i32
    return %arg0, %c0_i32, %arg1, %c0_i32_0 : i32, i32, i32, i32
  }
  func.func @transform_7(%arg0: i32, %arg1: i32) -> (i32, i32, i32, i32) {
    %c0_i32 = arith.constant 0 : i32
    %c0_i32_0 = arith.constant 0 : i32
    %c0_i32_1 = arith.constant 0 : i32
    return %arg0, %c0_i32, %arg1, %c0_i32_0 : i32, i32, i32, i32
  }
}

</mosaic_0001>

<bundles_post_ra>
// kernel: tpu_custom_call.1
= control target key start
LH: loop header
LB: loop body
LE: loop exit
PB: predicated region body
PF: predicated region fallthrough
CT: control target
= control target key end

     0   :  { %s1947_s0 = inlined_call_operand.hbm [shape: f32[2,8,32], index: 0, kind: input, shape index: {}]   ;;  %s1948_s1 = inlined_call_operand.vmem [shape: f32[1,32], index: 1, kind: input, shape index: {}]   ;;  %s1949_s2 = inlined_call_operand.vmem [shape: f32[1,32], index: 2, kind: input, shape index: {}]   ;;  %s1950_s3 = inlined_call_operand.hbm [shape: f32[32,96], index: 3, kind: input, shape index: {}]   ;;  %s1951_s4 = inlined_call_operand.vmem [shape: f32[1,96], index: 4, kind: input, shape index: {}]   ;;  %s1952_s5 = inlined_call_operand.hbm [shape: f32[2,4,8,8], index: 5, kind: output, shape index: {0}]   ;;  %s1953_s6 = inlined_call_operand.hbm [shape: f32[2,4,8,8], index: 6, kind: output, shape index: {1}]   ;;  %s1954_s7 = inlined_call_operand.hbm [shape: f32[2,4,8,8], index: 7, kind: output, shape index: {2}]  }
   0x1   :  { %1960 = sst [smem:[#allocation16_spill]] %s1950_s3 }
   0x2   :  { %13 = vsyncpa [#allocation3], 0 }
   0x3   :  { %15 = vsyncpa [#allocation3 + $0x1], 0 }
   0x4   :  { %16 = vsyncpa [#allocation6], 0 }
   0x5   :  { %17 = vsyncpa [#allocation4], 0 }
   0x6   :  { %19 = vsyncpa [#allocation4 + $0x1], 0 }
   0x7   :  { %20 = vsyncpa [#allocation9], 0 }
   0x8   :  { %22 = vsyncpa [#allocation9 + $0x1], 0  ;;  %s1564_s24 = smov 0   ;;  %s1566_s25 = smov 0  }
   0x9   :  { %s1568_s26 = smov 0   ;;  %s1570_s27 = smov 0  }
   0xa   :  { %s1572_s28 = smov 0   ;;  %s1574_s29 = smov 0  }
   0xb LB: > { %s1595_s30 = sadd.s32 4294967295, %s1503_s29   ;;  %s1958_s8 = sadd.s32 4294967294, %s1503_s29   ;;  %s1503_s29 = sphi %s1574_s29, %s28_s29   ;;  %s1499_s28 = sphi %s1572_s28, %s1983_s28   ;;  %s1495_s27 = sphi %s1570_s27, %s1982_s27   ;;  %s1491_s26 = sphi %s1568_s26, %s1981_s26   ;;  %s1487_s25 = sphi %s1566_s25, %s1980_s25   ;;  %s1483_s24 = sphi %s1564_s24, %s1979_s24  }
   0xc   : > { %p62_p0 = scmp.ne.s32.totalorder %s1487_s25, %s1483_s24  ;;  %p1955_p1 = scmp.eq.s32.totalorder %s1595_s30, 0 }
   0xd   : > { %p178_p3 = scmp.eq.s32.totalorder %s1958_s8, 1  ;;  %p1143_p5 = scmp.ge.s32.totalorder %s1503_s29, 1 }
   0xe   : > { %p1606_p4 = por %p1955_p1, %p62_p0  ;;  %p241_p7 = scmp.lt.s32.totalorder %s1503_s29, 3 }
   0xf   : > { %p1611_p6 = por %p178_p3, %p62_p0  ;;  %s1505_s12 = smov [#allocation5]  }
  0x10   : > { %s1961_s9 = scalar_select %p1606_p4, 1, 0 }
  0x11   : > { %s1962_s10 = scalar_select %p1611_p6, 1, 0 }
  0x12   : > { %p1616_p8 = pnand %p1143_p5, %p241_p7  ;;  %s259_s13 = sshll.u32 %s1505_s12, 4  ;;  %s260_s13 = int_to_ptr.vmem [resolvable:$true] %s259_s13 }
  0x13   : > { %s40_s15 = sadd.s32 1, %s1499_s28  ;;  %s1965_s3 = sld [smem:[#allocation16_spill]] }
  0x14   : > { %s1963_s11 = scalar_select %p1616_p8, 1, 0 }
  0x15   : > { %p1212_p9 = pneg %p1616_p8 }
  0x17   : > { %p1625_p11 = pnand %p1212_p9, %p1955_p1 }
  0x19   : > { %s1299_s18 = scalar_lea.hbm %s1965_s3, 512  ;;  %p1301_p13 = pneg %p1625_p11 }
  0x1a   : > { %p1300_p12 = scmp.ne.s32.totalorder %s1965_s3, %s1299_s18  ;;  %p1306_p5 = scmp.lt.u32.totalorder %s1299_s18, %s1965_s3 }
  0x1c   : > { %p1302_p0 = pnand %p1301_p13, %p1300_p12 }
  0x1e   : > { %p1303_p3 = pneg %p1302_p0 }
  0x20   : > { %p1308_p7 = pnand %p1306_p5, %p1303_p3 }
  0x22   : > { %1311 = shalt.err (!%p1308_p7)
}
  0x23   : > { %s1312_s23 = scalar_lea.vmem %s260_s13, 512  ;;  %p1320_p2 = scmp.lt.s32.totalorder %s260_s13, %s260_s13 }
  0x24   : > { %p1313_p9 = scmp.ne.s32.totalorder %s260_s13, %s1312_s23  ;;  %p1321_p6 = scmp.lt.s32.totalorder %s1312_s23, %s1312_s23 }
  0x26   : > { %p1315_p10 = pnand %p1313_p9, %p1301_p13  ;;  %p1322_p4 = por %p1321_p6, %p1320_p2 }
  0x28   : > { %p1316_p1 = pneg %p1315_p10 }
  0x2a   : > { %p1323_p8 = pnand %p1322_p4, %p1316_p1 }
  0x2c   : > { %1326 = shalt.err (!%p1323_p8)
}
  0x2d   : > { %s1506_s12 = smov 128   ;;  %s1507_s16 = smov 8  }
  0x2e   : > { %1215 = dma.hbm_to_vmem [thread:$0]  (!%p1625_p11), %s1965_s3, 512, %s260_s13, [#allocation6], %s1506_s12, %s1506_s12, %s1507_s16  }
  0x2f   : > { %p42_p1 = scmp.ge.s32.totalorder %s40_s15, 2  ;;  %s49_s19 = sadd.s32 1, %s1491_s26 }
  0x30   : > { %p56_p2 = scmp.ne.s32.totalorder %s1491_s26, %s1487_s25  ;;  %p57_p4 = scmp.eq.s32.totalorder %s1503_s29, 0 }
  0x31   : > { %s1985_s15 = smov (%p42_p1, %s40_s15), 0  ;;  %p1968_p8 = scmp.eq.s32.totalorder %s1595_s30, 1 }
  0x32   : > { %1966 = sst [smem:[#allocation15_spill]] %s1985_s15  ;;  %p1652_p6 = por %p57_p4, %p56_p2 }
  0x33   : > { %p1658_p10 = por %p1968_p8, %p56_p2  ;;  %s44_s14 = ssub.s32 %s1499_s28, %s1985_s15 }
  0x34   : > { %p1231_p12 = scmp.lt.s32.totalorder %s1503_s29, 2  ;;  %p47_p11 = scmp.eq.s32.totalorder %s44_s14, 0 }
  0x35   : > { %s276_s13 = sand.u32 1, %s1491_s26   ;;  %s1147_s12 = sshll.u32 %s1499_s28, 7 }
  0x36   : > { %s1146_s22 = sshll.u32 %s276_s13, 3  ;;  %s1673_s18 = scalar_lea.hbm %s1947_s0, %s1147_s12 }
  0x37   : > { %s1667_s23 = scalar_select %p47_p11, %s1491_s26, %s49_s19  }
  0x38   : > { %s280_s8 = scalar_lea.vmem [#allocation2], %s1146_s22  ;;  %p1679_p13 = pnand %p1231_p12, %p1652_p6 }
  0x39   : > { %s288_s3 = sshll.u32 %s280_s8, 4  ;;  %s277_s19 = scalar_lea.sflag [#allocation3], %s276_s13  ;;  %s1675_s3 = int_to_ptr.vmem [resolvable:$true] %s288_s3 }
  0x3a   : > { %s1327_s15 = scalar_lea.hbm %s1673_s18, 128  ;;  %p1329_p3 = pneg %p1679_p13 }
  0x3b   : > { %p1328_p0 = scmp.ne.s32.totalorder %s1673_s18, %s1327_s15  ;;  %s1332_s12 = scalar_lea.hbm %s1947_s0, 256 }
  0x3c   : > { %p1333_p9 = scmp.lt.u32.totalorder %s1673_s18, %s1947_s0  ;;  %p1334_p1 = scmp.lt.u32.totalorder %s1332_s12, %s1327_s15 }
  0x3d   : > { %p1330_p5 = pnand %p1329_p3, %p1328_p0  ;;  %p1336_p4 = scmp.lt.u32.totalorder %s1327_s15, %s1673_s18 }
  0x3e   : > { %p1335_p2 = por %p1334_p1, %p1333_p9 }
  0x3f   : > { %p1331_p7 = pneg %p1330_p5 }
  0x40   : > { %p1337_p6 = por %p1336_p4, %p1335_p2 }
  0x42   : > { %p1338_p8 = pnand %p1337_p6, %p1331_p7 }
  0x44   : > { %1341 = shalt.err (!%p1338_p8)
}
  0x45   : > { %s1342_s13 = scalar_lea.vmem %s1675_s3, 128  ;;  %s1508_s17 = smov [#allocation2]  }
  0x46   : > { %p1343_p12 = scmp.ne.s32.totalorder %s1675_s3, %s1342_s13  ;;  %s1347_s22 = sshll.u32 %s1508_s17, 4  ;;  %s1348_s22 = int_to_ptr.vmem [resolvable:$false] %s1347_s22 }
  0x47   : > { %s1349_s8 = scalar_lea.vmem %s1348_s22, 256  ;;  %p1350_p5 = scmp.lt.s32.totalorder %s1675_s3, %s1348_s22 }
  0x48   : > { %p1345_p11 = pnand %p1343_p12, %p1329_p3  ;;  %p1351_p9 = scmp.lt.s32.totalorder %s1349_s8, %s1342_s13 }
  0x4a   : > { %p1346_p0 = pneg %p1345_p11  ;;  %p1352_p1 = por %p1351_p9, %p1350_p5 }
  0x4c   : > { %p1353_p2 = pnand %p1352_p1, %p1346_p0 }
  0x4e   : > { %1356 = shalt.err (!%p1353_p2)
}
  0x4f   : > { %1219 = dma.hbm_to_vmem [thread:$0]  (!%p1679_p13), %s1673_s18, 128, %s1675_s3, %s277_s19  }
  0x50   : > { %p1971_p7 = scmp.ne.s32.totalorder %s1963_s11, 0 }
  0x51   : > { %s1711_s15 = sand.u32 (!%p1971_p7), 1, %s1487_s25   ;;  %p1972_p3 = scmp.ne.s32.totalorder (!%p1971_p7), %s1961_s9, 0 }
  0x52   : > { %297 = sbr.rel (%p1971_p7) target bundleno = 917 (0x395), region = 40  ;;  %s1149_s12 = sshll.u32 (!%p1971_p7), %s1711_s15, 3 }
  0x53   : > { %s300_s20 = scalar_lea.sflag (!%p1971_p7), [#allocation3], %s1711_s15  ;;  %s303_s16 = scalar_lea.vmem (!%p1971_p7), [#allocation2], %s1149_s12 }
  0x59   : > { %1466 = dma.done.wait (%p1972_p3), %s300_s20, 128  }
  0x5a   : > { %1468 = vsyncadd (%p1972_p3), %s300_s20, 4294967168  ;;  %p1973_p4 = scmp.eq.s32.totalorder %s1595_s30, 0 }
  0x5c   : > { %1470 = dma.done.wait (%p1973_p4), [#allocation6], 512   ;;  %p1974_p13 = pmov %p1973_p4 }
  0x5d   : > { %vm351_vm0 = vcmask 261120   ;;  %v348_v0 = vld [vmem:[%s303_s16] sm:$0xff]  ;;  %v380_v7 = vld [vmem:[#allocation5] sm:$0xff]  ;;  %v381_v8 = vld [vmem:[#allocation5 + $0x8] sm:$0xff]  ;;  %v1509_v10 = vmov 0.0|0.0   ;;  %vm1510_vm1 = vmmov 0   ;;  %v479_v30 = vlaneseq }
  0x5e   : > { %1472 = vsyncadd (%p1974_p13), [#allocation6], 4294966784  ;;  %v352_v1 = vsel %vm351_vm0, %v348_v0, 0.0  ;;  %v382_v9 = vld [vmem:[#allocation5 + $0x10] sm:$0xff]  ;;  %1194 = vmatprep.subr.bf16.mxu0 %v1509_v10  ;;  %v1195_v11 = vpack.c.bf16 %v381_v8, %v380_v7  ;;  %v383_v12 = vld [vmem:[#allocation5 + $0x18] sm:$0xff]  ;;  %v1511_v13 = vmov 0.0  }
  0x5f   : > { %353 = vadd.xlane.f32.xlu0 %v352_v1  ;;  %1191 = vmatprep.mubr.msk.f32.mxu0 %vm1510_vm1, %v1511_v13  ;;  %v1198_v14 = vpack.c.bf16 %v383_v12, %v382_v9  ;;  %v1154_v19 = vld [vmem:[%s1948_s1] ss:$0 sm:$0xff]  ;;  %s1512_s13 = smov 104   ;;  %s1513_s17 = smov 120   ;;  %v1517_v28 = vmov 1983009808  }
  0x60   : > { %1196 = vmatpush3.bf16.msra.mxu0 %v1195_v11  ;;  %v1155_v21 = vld [vmem:[%s1949_s2] ss:$0 sm:$0xff]  ;;  %s1514_s22 = smov 112   ;;  %s1515_s8 = smov 96   ;;  %v477_v29 = vunpack.c.l.s4 %v1517_v28  ;;  %v1518_v31 = vmov 1934713408  }
  0x61   : > { %1197 = vmatprep.subr.bf16.mxu0 %v1509_v10  ;;  %v1156_v24 = vld [vmem:[%s1951_s4] ss:$0 sm:$0xff]  ;;  %s1516_s12 = smov 64   ;;  %v509_v32 = vunpack.c.l.s4 %v1518_v31  ;;  %v480_v34 = vshrl.u32 %v479_v30, 7  ;;  %s1764_s20 = sshll.u32 %s1711_s15, 5  ;;  %vm614_vm2 = vcmask 64512  }
  0x62   : > { %v478_v33 = vunpack.c.0.s8 %v477_v29  ;;  %s1767_s16 = sshll.u32 %s1495_s27, 9  ;;  %s333_s3 = scalar_lea.vmem [#allocation7], %s1764_s20 }
  0x63   : > { %v510_v37 = vunpack.c.0.s8 %v509_v32  ;;  %s1778_s27 = scalar_lea.hbm %s1952_s5, %s1767_s16  ;;  %s948_s18 = sshll.u32 %s333_s3, 4  ;;  %s1780_s18 = int_to_ptr.vmem [resolvable:$true] %s948_s18 }
  0x64   : > { %1199 = vmatpush3.bf16.msra.mxu0 %v1198_v14  ;;  %v1738_v38 = vsub.s32 %v478_v33, %v480_v34  ;;  %s924_s14 = scalar_lea.sflag [#allocation4], %s1711_s15  ;;  %s1357_s19 = scalar_lea.vmem %s1780_s18, 512 }
  0x65   : > { %v1742_v44 = vsub.s32 %v510_v37, %v480_v34  ;;  %p1358_p6 = scmp.ne.s32.totalorder %s1780_s18, %s1357_s19 }
  0x67   : > { %p1359_p8 = pnand %p1358_p6, %p1658_p10 }
  0x69   : > { %p1360_p12 = pneg %p1359_p8 }
  0xec   : > { %v354_v2 = vpop.xlane.xlu0 %353 }
  0xed   : > { %v356_v3 = vmul.f32 0.03125, %v354_v2 }
  0xef   : > { %v357_v4 = vsub.f32 %v348_v0, %v356_v3 }
  0xf1   : > { %v358_v5 = vmul.f32 %v357_v4, %v357_v4 }
  0xf3   : > { %v359_v6 = vsel %vm351_vm0, %v358_v5, 0.0 }
  0xf4   : > { %360 = vadd.xlane.f32.xlu0 %v359_v6 }
 0x181   : > { %v361_v15 = vpop.xlane.xlu0 %360 }
 0x182   : > { %v362_v16 = vmul.f32 0.03125, %v361_v15 }
 0x184   : > { %v363_v17 = vadd.f32 1e-05, %v362_v16 }
 0x186   : > { %1297 = vrsqrt.f32 %v363_v17 }
 0x190   : > { %v1298_v18 = vpop.eup %1297 }
 0x191   : > { %v365_v20 = vmul.f32 %v1298_v18, %v357_v4 }
 0x193   : > { %v372_v22 = vmul.f32 %v1154_v19, %v365_v20 }
 0x195   : > { %v379_v23 = vadd.f32 %v1155_v21, %v372_v22 }
 0x197   : > { %1192 = vmatmul.mubr.msk.f32.vlgmr.msra.gmra.mrb[0].mxu0 %vm351_vm0, %v379_v23 }
 0x26a   : > { %v460_v25 = vpop.f32.mrb[0].mxu0 }
 0x26b   : > { %v461_v26 = vadd.f32 %v1156_v24, %v460_v25  ;;  %v1193_v27 = vpop.f32.mrb[1].mxu0 }
 0x26d   : > { %471 = vrot.lane.b32.xlu0 %v461_v26, %s1512_s13  ;;  %465 = vrot.lane.b32.xlu1 %v461_v26, %s1513_s17  ;;  %s1519_s13 = smov [#allocation7]  }
 0x26e   : > { %s1361_s17 = sshll.u32 %s1519_s13, 4  ;;  %s1362_s17 = int_to_ptr.vmem [resolvable:$false] %s1361_s17 }
 0x26f   : > { %p1364_p11 = scmp.lt.s32.totalorder %s1780_s18, %s1362_s17 }
 0x271   : > { %468 = vrot.lane.b32.xlu1 %v461_v26, %s1514_s22  ;;  %s1363_s22 = scalar_lea.vmem %s1362_s17, 1024 }
 0x272   : > { %p1365_p0 = scmp.lt.s32.totalorder %s1363_s22, %s1357_s19 }
 0x274   : > { %p1366_p5 = por %p1365_p0, %p1364_p11 }
 0x275   : > { %619 = vrot.lane.b32.xlu1 %v461_v26, %s1515_s8 }
 0x276   : > { %p1367_p9 = pnand %p1366_p5, %p1360_p12 }
 0x279   : > { %771 = vrot.lane.b32.xlu1 %v461_v26, %s1516_s12 }
 0x2df   : > { %v472_v35 = vpop.permute.xlu0 %471  ;;  %v466_v36 = vpop.permute.xlu1 %465 }
 0x2e0   : > { %621 = vrot.lane.b32.xlu1 %v466_v36, %s1515_s8  ;;  %v490_v39 = vcombine.low %v466_v36, %v472_v35  ;;  %v491_v40 = vcombine.high %v466_v36, %v472_v35 }
 0x2e2   : > { %v498_v45 = vrot.slane %v490_v39, %v1738_v38  ;;  %v505_v46 = vrot.slane %v491_v40, %v1738_v38 }
 0x2e3   : > { %v469_v41 = vpop.permute.xlu1 %468 }
 0x2e4   : > { %v474_v42 = vcombine.low %v461_v26, %v469_v41  ;;  %v475_v43 = vcombine.high %v461_v26, %v469_v41  ;;  %775 = vrot.lane.b32.xlu0 %v469_v41, %s1516_s12  ;;  %623 = vrot.lane.b32.xlu1 %v469_v41, %s1515_s8 }
 0x2e6   : > { %v482_v47 = vrot.slane %v474_v42, %v1738_v38  ;;  %v489_v48 = vrot.slane %v475_v43, %v1738_v38 }
 0x2e8   : > { %v506_v49 = vcombine.low %v482_v47, %v498_v45  ;;  %v507_v50 = vcombine.high %v482_v47, %v498_v45  ;;  %v522_v51 = vcombine.low %v489_v48, %v505_v46  ;;  %v523_v52 = vcombine.high %v489_v48, %v505_v46  ;;  %625 = vrot.lane.b32.xlu1 %v472_v35, %s1515_s8 }
 0x2ea   : > { %v514_v53 = vrot.slane %v506_v49, %v1742_v44  ;;  %v521_v54 = vrot.slane %v507_v50, %v1742_v44  ;;  %v530_v55 = vrot.slane %v522_v51, %v1742_v44  ;;  %v537_v56 = vrot.slane %v523_v52, %v1742_v44 }
 0x2ec   : > { %v542_v57 = vcombine.low %v514_v53, %v521_v54  ;;  %v1158_v58 = vcombine.high %v514_v53, %v521_v54  ;;  %v558_v59 = vcombine.low %v530_v55, %v537_v56  ;;  %v1159_v60 = vcombine.high %v530_v55, %v537_v56  ;;  %773 = vrot.lane.b32.xlu1 %v466_v36, %s1516_s12 }
 0x2ee   : > { %v549_v61 = vrot.slane %v542_v57, %v1738_v38  ;;  %v557_v62 = vrot.slane %v1158_v58, %v1738_v38  ;;  %v565_v63 = vrot.slane %v558_v59, %v1738_v38  ;;  %v573_v0 = vrot.slane %v1159_v60, %v1738_v38 }
 0x2f0   : > { %v574_v1 = vcombine.low %v549_v61, %v557_v62  ;;  %v575_v2 = vcombine.high %v549_v61, %v557_v62  ;;  %v590_v3 = vcombine.low %v565_v63, %v573_v0  ;;  %v591_v4 = vcombine.high %v565_v63, %v573_v0  ;;  %777 = vrot.lane.b32.xlu1 %v472_v35, %s1516_s12 }
 0x2f2   : > { %v582_v5 = vrot.slane %v574_v1, %v1742_v44  ;;  %v589_v6 = vrot.slane %v575_v2, %v1742_v44  ;;  %v598_v7 = vrot.slane %v590_v3, %v1742_v44  ;;  %v605_v8 = vrot.slane %v591_v4, %v1742_v44 }
 0x2f4   : > { %v606_v9 = vcombine.low %v582_v5, %v598_v7  ;;  %v607_v10 = vcombine.high %v582_v5, %v598_v7  ;;  %v608_v11 = vcombine.low %v589_v6, %v605_v8  ;;  %v609_v12 = vcombine.high %v589_v6, %v605_v8 }
 0x2f6   : > { %v610_v13 = vmul.f32 0.35355338, %v606_v9  ;;  %v611_v14 = vmul.f32 0.35355338, %v607_v10  ;;  %v612_v15 = vmul.f32 0.35355338, %v608_v11 }
 0x2f7   : > { %v613_v16 = vmul.f32 0.35355338, %v609_v12 }
 0x2f8   : > { %615 = vst.msk [vmem:[%s333_s3] sm:$0xff] %vm614_vm2, %v610_v13  ;;  %616 = vst.msk [vmem:[%s333_s3 + $0x8] sm:$0xff] %vm614_vm2, %v611_v14 }
 0x2f9   : > { %617 = vst.msk [vmem:[%s333_s3 + $0x10] sm:$0xff] %vm614_vm2, %v612_v15  ;;  %618 = vst.msk [vmem:[%s333_s3 + $0x18] sm:$0xff] %vm614_vm2, %v613_v16 }
 0x2fa   : > { %1370 = shalt.err (!%p1367_p9)
}
 0x2fb   : > { %s1371_s8 = scalar_lea.hbm %s1778_s27, 512  ;;  %s1375_s9 = scalar_lea.hbm %s1952_s5, 1024 }
 0x2fc   : > { %p1372_p1 = scmp.ne.s32.totalorder %s1778_s27, %s1371_s8  ;;  %p1376_p3 = scmp.lt.u32.totalorder %s1778_s27, %s1952_s5 }
 0x2fd   : > { %p1377_p4 = scmp.lt.u32.totalorder %s1375_s9, %s1371_s8  ;;  %p1379_p6 = scmp.lt.u32.totalorder %s1371_s8, %s1778_s27 }
 0x2fe   : > { %p1373_p2 = pnand %p1372_p1, %p1658_p10 }
 0x2ff   : > { %p1378_p13 = por %p1377_p4, %p1376_p3 }
 0x300   : > { %p1374_p7 = pneg %p1373_p2 }
 0x301   : > { %p1380_p8 = por %p1379_p6, %p1378_p13 }
 0x303   : > { %p1381_p12 = pnand %p1380_p8, %p1374_p7 }
 0x305   : > { %1384 = shalt.err (!%p1381_p12)
}
 0x306   : > { %s1520_s19 = smov 128   ;;  %s1521_s17 = smov 8   ;;  %v620_v17 = vpop.permute.xlu1 %619 }
 0x307   : > { %1206 = dma.vmem_to_hbm [thread:$0]  (%p1658_p10), %s1780_s18, 512, %s1778_s27, %s924_s14, %s1520_s19, %s1520_s19, %s1521_s17  }
 0x308   : > { %s928_s15 = sand.u32 1, %s1595_s30   ;;  %s340_s27 = scalar_lea.vmem [#allocation8], %s1764_s20 }
 0x309   : > { %s965_s18 = sshll.u32 %s340_s27, 4  ;;  %s1839_s8 = scalar_lea.hbm %s1953_s6, %s1767_s16  ;;  %s1841_s18 = int_to_ptr.vmem [resolvable:$true] %s965_s18 }
 0x30a   : > { %v772_v18 = vpop.permute.xlu1 %771  ;;  %s1853_s12 = scalar_lea.sflag [#allocation9], %s928_s15  ;;  %s1385_s3 = scalar_lea.vmem %s1841_s18, 512 }
 0x30b   : > { %p1386_p11 = scmp.ne.s32.totalorder %s1841_s18, %s1385_s3  ;;  %s1522_s9 = smov [#allocation8]  }
 0x30c   : > { %s1389_s11 = sshll.u32 %s1522_s9, 4  ;;  %s1390_s11 = int_to_ptr.vmem [resolvable:$false] %s1389_s11 }
 0x30d   : > { %p1387_p0 = pnand %p1386_p11, %p1658_p10  ;;  %s1391_s13 = scalar_lea.vmem %s1390_s11, 1024 }
 0x30e   : > { %p1392_p9 = scmp.lt.s32.totalorder %s1841_s18, %s1390_s11  ;;  %p1393_p1 = scmp.lt.s32.totalorder %s1391_s13, %s1385_s3 }
 0x30f   : > { %p1388_p5 = pneg %p1387_p0 }
 0x310   : > { %p1394_p2 = por %p1393_p1, %p1392_p9 }
 0x312   : > { %p1395_p7 = pnand %p1394_p2, %p1388_p5 }
 0x352   : > { %v622_v19 = vpop.permute.xlu1 %621 }
 0x356   : > { %v624_v20 = vpop.permute.xlu1 %623  ;;  %v776_v31 = vpop.permute.xlu0 %775 }
 0x357   : > { %v631_v21 = vcombine.low %v620_v17, %v624_v20  ;;  %v632_v22 = vcombine.high %v620_v17, %v624_v20  ;;  %v783_v41 = vcombine.low %v772_v18, %v776_v31  ;;  %v784_v42 = vcombine.high %v772_v18, %v776_v31 }
 0x359   : > { %v639_v26 = vrot.slane %v631_v21, %v1738_v38  ;;  %v646_v27 = vrot.slane %v632_v22, %v1738_v38  ;;  %v791_v55 = vrot.slane %v783_v41, %v1738_v38  ;;  %v798_v56 = vrot.slane %v784_v42, %v1738_v38 }
 0x35a   : > { %v626_v23 = vpop.permute.xlu1 %625 }
 0x35b   : > { %v647_v24 = vcombine.low %v622_v19, %v626_v23  ;;  %v648_v25 = vcombine.high %v622_v19, %v626_v23 }
 0x35d   : > { %v655_v28 = vrot.slane %v647_v24, %v1738_v38  ;;  %v662_v29 = vrot.slane %v648_v25, %v1738_v38 }
 0x35e   : > { %v774_v30 = vpop.permute.xlu1 %773 }
 0x35f   : > { %v663_v32 = vcombine.low %v639_v26, %v655_v28  ;;  %v664_v33 = vcombine.high %v639_v26, %v655_v28  ;;  %v679_v34 = vcombine.low %v646_v27, %v662_v29  ;;  %v680_v35 = vcombine.high %v646_v27, %v662_v29 }
 0x361   : > { %v671_v36 = vrot.slane %v663_v32, %v1742_v44  ;;  %v678_v37 = vrot.slane %v664_v33, %v1742_v44  ;;  %v687_v39 = vrot.slane %v679_v34, %v1742_v44  ;;  %v694_v40 = vrot.slane %v680_v35, %v1742_v44 }
 0x362   : > { %v778_v43 = vpop.permute.xlu1 %777 }
 0x363   : > { %v699_v45 = vcombine.low %v671_v36, %v678_v37  ;;  %v1160_v46 = vcombine.high %v671_v36, %v678_v37  ;;  %v715_v47 = vcombine.low %v687_v39, %v694_v40  ;;  %v1161_v48 = vcombine.high %v687_v39, %v694_v40 }
 0x364   : > { %v799_v49 = vcombine.low %v774_v30, %v778_v43  ;;  %v800_v50 = vcombine.high %v774_v30, %v778_v43 }
 0x365   : > { %v706_v51 = vrot.slane %v699_v45, %v1738_v38  ;;  %v714_v52 = vrot.slane %v1160_v46, %v1738_v38  ;;  %v722_v53 = vrot.slane %v715_v47, %v1738_v38  ;;  %v730_v54 = vrot.slane %v1161_v48, %v1738_v38 }
 0x366   : > { %v807_v57 = vrot.slane %v799_v49, %v1738_v38  ;;  %v814_v58 = vrot.slane %v800_v50, %v1738_v38 }
 0x367   : > { %v731_v59 = vcombine.low %v706_v51, %v714_v52  ;;  %v732_v60 = vcombine.high %v706_v51, %v714_v52  ;;  %v747_v61 = vcombine.low %v722_v53, %v730_v54  ;;  %v748_v62 = vcombine.high %v722_v53, %v730_v54 }
 0x368   : > { %v815_v63 = vcombine.low %v791_v55, %v807_v57  ;;  %v816_v0 = vcombine.high %v791_v55, %v807_v57  ;;  %v831_v1 = vcombine.low %v798_v56, %v814_v58  ;;  %v832_v2 = vcombine.high %v798_v56, %v814_v58 }
 0x369   : > { %v739_v3 = vrot.slane %v731_v59, %v1742_v44  ;;  %v746_v4 = vrot.slane %v732_v60, %v1742_v44  ;;  %v755_v5 = vrot.slane %v747_v61, %v1742_v44  ;;  %v762_v6 = vrot.slane %v748_v62, %v1742_v44 }
 0x36a   : > { %v823_v7 = vrot.slane %v815_v63, %v1742_v44  ;;  %v830_v8 = vrot.slane %v816_v0, %v1742_v44  ;;  %v839_v9 = vrot.slane %v831_v1, %v1742_v44  ;;  %v846_v10 = vrot.slane %v832_v2, %v1742_v44 }
 0x36b   : > { %v763_v11 = vcombine.low %v739_v3, %v755_v5  ;;  %v764_v12 = vcombine.high %v739_v3, %v755_v5  ;;  %v765_v13 = vcombine.low %v746_v4, %v762_v6  ;;  %v766_v14 = vcombine.high %v746_v4, %v762_v6 }
 0x36c   : > { %v851_v15 = vcombine.low %v823_v7, %v830_v8  ;;  %v1162_v16 = vcombine.high %v823_v7, %v830_v8  ;;  %v867_v17 = vcombine.low %v839_v9, %v846_v10  ;;  %v1163_v18 = vcombine.high %v839_v9, %v846_v10 }
 0x36d   : > { %767 = vst.msk [vmem:[%s340_s27] sm:$0xff] %vm614_vm2, %v763_v11  ;;  %768 = vst.msk [vmem:[%s340_s27 + $0x8] sm:$0xff] %vm614_vm2, %v764_v12 }
 0x36e   : > { %769 = vst.msk [vmem:[%s340_s27 + $0x10] sm:$0xff] %vm614_vm2, %v765_v13  ;;  %770 = vst.msk [vmem:[%s340_s27 + $0x18] sm:$0xff] %vm614_vm2, %v766_v14  ;;  %v858_v19 = vrot.slane %v851_v15, %v1738_v38  ;;  %v866_v20 = vrot.slane %v1162_v16, %v1738_v38  ;;  %v874_v21 = vrot.slane %v867_v17, %v1738_v38 }
 0x36f   : > { %v882_v22 = vrot.slane %v1163_v18, %v1738_v38 }
 0x370   : > { %1398 = shalt.err (!%p1395_p7)
}
 0x371   : > { %s1399_s30 = scalar_lea.hbm %s1839_s8, 512  ;;  %s1403_s14 = scalar_lea.hbm %s1953_s6, 1024 }
 0x372   : > { %p1400_p3 = scmp.ne.s32.totalorder %s1839_s8, %s1399_s30  ;;  %p1404_p6 = scmp.lt.u32.totalorder %s1839_s8, %s1953_s6 }
 0x373   : > { %p1405_p8 = scmp.lt.u32.totalorder %s1403_s14, %s1399_s30  ;;  %p1407_p11 = scmp.lt.u32.totalorder %s1399_s30, %s1839_s8 }
 0x374   : > { %p1401_p4 = pnand %p1400_p3, %p1658_p10 }
 0x375   : > { %p1406_p12 = por %p1405_p8, %p1404_p6 }
 0x376   : > { %p1402_p13 = pneg %p1401_p4 }
 0x377   : > { %p1408_p0 = por %p1407_p11, %p1406_p12 }
 0x379   : > { %p1409_p5 = pnand %p1408_p0, %p1402_p13 }
 0x37b   : > { %1412 = shalt.err (!%p1409_p5)
}
 0x37c   : > { %1207 = dma.vmem_to_hbm [thread:$0]  (%p1658_p10), %s1841_s18, 512, %s1839_s8, %s1853_s12, %s1520_s19, %s1520_s19, %s1521_s17   ;;  %v883_v38 = vcombine.low %v858_v19, %v866_v20  ;;  %v884_v23 = vcombine.high %v858_v19, %v866_v20  ;;  %v899_v24 = vcombine.low %v874_v21, %v882_v22  ;;  %v900_v25 = vcombine.high %v874_v21, %v882_v22 }
 0x37d   : > { %s347_s3 = scalar_lea.vmem [#allocation10], %s1764_s20  ;;  %s1889_s13 = scalar_lea.hbm %s1954_s7, %s1767_s16 }
 0x37e   : > { %s982_s11 = sshll.u32 %s347_s3, 4  ;;  %v891_v26 = vrot.slane %v883_v38, %v1742_v44  ;;  %v898_v27 = vrot.slane %v884_v23, %v1742_v44  ;;  %v907_v28 = vrot.slane %v899_v24, %v1742_v44  ;;  %v914_v29 = vrot.slane %v900_v25, %v1742_v44  ;;  %s1523_s16 = smov [#allocation10]   ;;  %s1891_s11 = int_to_ptr.vmem [resolvable:$true] %s982_s11 }
 0x37f   : > { %s1413_s20 = scalar_lea.vmem %s1891_s11, 512  ;;  %s1417_s30 = sshll.u32 %s1523_s16, 4  ;;  %s1418_s30 = int_to_ptr.vmem [resolvable:$false] %s1417_s30 }
 0x380   : > { %v915_v30 = vcombine.low %v891_v26, %v907_v28  ;;  %v916_v31 = vcombine.high %v891_v26, %v907_v28  ;;  %v917_v32 = vcombine.low %v898_v27, %v914_v29  ;;  %v918_v33 = vcombine.high %v898_v27, %v914_v29  ;;  %p1414_p9 = scmp.ne.s32.totalorder %s1891_s11, %s1413_s20  ;;  %s1419_s15 = scalar_lea.vmem %s1418_s30, 1024 }
 0x381   : > { %p1420_p7 = scmp.lt.s32.totalorder %s1891_s11, %s1418_s30  ;;  %p1421_p3 = scmp.lt.s32.totalorder %s1419_s15, %s1413_s20 }
 0x382   : > { %919 = vst.msk [vmem:[%s347_s3] sm:$0xff] %vm614_vm2, %v915_v30  ;;  %920 = vst.msk [vmem:[%s347_s3 + $0x8] sm:$0xff] %vm614_vm2, %v916_v31  ;;  %p1415_p1 = pnand %p1414_p9, %p1658_p10 }
 0x383   : > { %921 = vst.msk [vmem:[%s347_s3 + $0x10] sm:$0xff] %vm614_vm2, %v917_v32  ;;  %922 = vst.msk [vmem:[%s347_s3 + $0x18] sm:$0xff] %vm614_vm2, %v918_v33  ;;  %p1422_p4 = por %p1421_p3, %p1420_p7 }
 0x384   : > { %p1416_p2 = pneg %p1415_p1 }
 0x386   : > { %p1423_p13 = pnand %p1422_p4, %p1416_p2 }
 0x388   : > { %1426 = shalt.err (!%p1423_p13)
}
 0x389   : > { %s1427_s27 = scalar_lea.hbm %s1889_s13, 512  ;;  %s1431_s9 = scalar_lea.hbm %s1954_s7, 1024 }
 0x38a   : > { %p1428_p6 = scmp.ne.s32.totalorder %s1889_s13, %s1427_s27  ;;  %p1432_p11 = scmp.lt.u32.totalorder %s1889_s13, %s1954_s7 }
 0x38b   : > { %p1433_p0 = scmp.lt.u32.totalorder %s1431_s9, %s1427_s27  ;;  %p1435_p9 = scmp.lt.u32.totalorder %s1427_s27, %s1889_s13 }
 0x38c   : > { %p1429_p8 = pnand %p1428_p6, %p1658_p10 }
 0x38d   : > { %p1434_p5 = por %p1433_p0, %p1432_p11 }
 0x38e   : > { %p1430_p12 = pneg %p1429_p8 }
 0x38f   : > { %p1436_p1 = por %p1435_p9, %p1434_p5 }
 0x391   : > { %p1437_p2 = pnand %p1436_p1, %p1430_p12 }
 0x393   : > { %1440 = shalt.err (!%p1437_p2)
}
 0x394   : > { %1208 = dma.vmem_to_hbm [thread:$0]  (%p1658_p10), %s1891_s11, 512, %s1889_s13, %s1853_s12, %s1520_s19, %s1520_s19, %s1521_s17  }
 0x395 PF: > { %s997_s8 = sand.u32 1, %s1483_s24   ;;  %p1975_p7 = scmp.ne.s32.totalorder %s1962_s10, 0 }
 0x396   : > { %p1976_p3 = scmp.ge.s32.totalorder %s1503_s29, 2  ;;  %s998_s20 = scalar_lea.sflag [#allocation4], %s997_s8 }
 0x398   : > { %p1221_p4 = pnand %p1976_p3, %p1975_p7 }
 0x39a   : > { %1474 = dma.done.wait (!%p1221_p4), %s998_s20, 512  }
 0x39b   : > { %1476 = vsyncadd (!%p1221_p4), %s998_s20, 4294966784  ;;  %s1977_s21 = sadd.s32 4294967294, %s1503_s29  }
 0x39c   : > { %s1006_s16 = sand.u32 1, %s1977_s21  }
 0x39d   : > { %s1007_s30 = scalar_lea.sflag [#allocation9], %s1006_s16 }
 0x39e   : > { %1478 = dma.done.wait (!%p1221_p4), %s1007_s30, 1024  }
 0x39f   : > { %1480 = vsyncadd (!%p1221_p4), %s1007_s30, 4294966272  ;;  %s28_s29 = sadd.s32 1, %s1503_s29   ;;  %s1978_s19 = sld [smem:[#allocation15_spill]] }
 0x3a0   : > { %p25_p10 = scmp.ge.s32.totalorder %s28_s29, 4   ;;  %s1979_s24 = smov %s1487_s25 }
 0x3a1   : > { %s1980_s25 = smov %s1491_s26  ;;  %s1981_s26 = smov %s1667_s23 }
 0x3a2   : > { %s1982_s27 = smov %s1499_s28  ;;  %27 = sbr.rel (!%p25_p10) target bundleno = 11 (0xb), region = 121 }
 0x3a5   : > { %s1983_s28 = smov %s1978_s19 }
 0x3a9   :  { %1021 = vsyncpa [#allocation3], 1 }
 0x3aa   :  { %1023 = vsyncpa [#allocation3 + $0x1], 1 }
 0x3ab   :  { %1024 = vsyncpa [#allocation6], 1 }
 0x3ac   :  { %1025 = vsyncpa [#allocation4], 1 }
 0x3ad   :  { %1027 = vsyncpa [#allocation4 + $0x1], 1 }
 0x3ae   :  { %1028 = vsyncpa [#allocation9], 1 }
 0x3af   :  { %1030 = vsyncpa [#allocation9 + $0x1], 1 }

</bundles_post_ra>
